<compile_context>
chip_gen: v6e
topology: v6e:2x2x1
jax: 0.10.0
libtpu: 0.0.40
codegen_flags: <defaults>
</compile_context>

<pallas_src>
import jax
import jax.numpy as jnp
from jax.experimental import pallas as pl
from jax.experimental.pallas import tpu as pltpu


def _round_up(x, m):
    return ((x + m - 1) // m) * m


def _logreg_kernel(x_ref, w_ref, b_ref, o_ref):
    # x_ref: (TILE_B, F) VMEM tile of the input stream
    # w_ref: (1, F)      VMEM weight row, resident across the whole grid
    # b_ref: (1,)        SMEM scalar bias
    # o_ref: (TILE_B, 1) VMEM output tile
    x = x_ref[...]
    w = w_ref[...]
    # Lane-dense VPU multiply + cross-lane reduce (avoids a lane-sparse N=1 MXU matmul).
    logits = jnp.sum(x * w, axis=-1, keepdims=True) + b_ref[0]
    o_ref[...] = jax.nn.sigmoid(logits).astype(o_ref.dtype)


def logistic_regression_forward(x, w_row, b, *, max_tile_b=1024):
    """sigmoid(x @ w_row.T + b)  ==  PyTorch LogisticRegression.forward(x).

    x:     (B, F) float32
    w_row: (1, F) float32   (PyTorch nn.Linear weight layout, used as-is)
    b:     (1,)   float32
    returns (B, 1) float32
    """
    B, F = x.shape
    assert w_row.shape == (1, F)
    assert b.shape == (1,)

    # Batch tile: large enough to approach the HBM roofline, small enough that the
    # double-buffered x stream (2 * tile_b * F * 4 bytes) fits every generation's VMEM.
    stream_budget = 24 * 1024 * 1024          # bytes for the double-buffered x stream
    bytes_per_row = F * 4
    tile_b = min(max_tile_b, max(8, stream_budget // (2 * bytes_per_row)))
    tile_b = max(8, (tile_b // 8) * 8)        # (8, 128) sublane constraint
    tile_b = min(tile_b, _round_up(B, 8))     # don't exceed the (padded) batch

    B_pad = _round_up(B, tile_b)
    if B_pad != B:
        x = jnp.pad(x, ((0, B_pad - B), (0, 0)))

    grid = (B_pad // tile_b,)

    cost = pl.CostEstimate(
        flops=2 * B_pad * F,
        transcendentals=B_pad,                         # one exp per sigmoid
        bytes_accessed=4 * (B_pad * F + F + B_pad + 1),
    )

    out = pl.pallas_call(
        _logreg_kernel,
        out_shape=jax.ShapeDtypeStruct((B_pad, 1), jnp.float32),
        grid_spec=pltpu.PrefetchScalarGridSpec(
            num_scalar_prefetch=0,
            grid=grid,
            in_specs=[
                # x streams tile-by-tile over the batch (auto double-buffered).
                pl.BlockSpec((tile_b, F), lambda i: (i, 0)),
                # Weight row: constant block index -> fetched once, stays resident.
                pl.BlockSpec((1, F), lambda i: (0, 0)),
                # Bias: scalar through SMEM (no per-step (1,1) VMEM tile DMA).
                pl.BlockSpec(memory_space=pltpu.MemorySpace.SMEM),
            ],
            out_specs=pl.BlockSpec((tile_b, 1), lambda i: (i, 0)),
        ),
        compiler_params=pltpu.CompilerParams(
            dimension_semantics=("parallel",),     # megacore sharding on v7x
            vmem_limit_bytes=48 * 1024 * 1024,     # > v5e/v6e scoped defaults, < v7x physical
        ),
        cost_estimate=cost,
    )(x, w_row, b)

    return out[:B]


if __name__ == "__main__":
    # Small shapes consistent with the module: batch=8, num_features=32.
    batch, num_features = 8, 32

    key = jax.random.PRNGKey(0)
    kx, kw, kb = jax.random.split(key, 3)

    x = jax.random.normal(kx, (batch, num_features), dtype=jnp.float32)
    # Deterministic params (mimics nn.Linear uniform(-1/sqrt(F), 1/sqrt(F)) init).
    bound = 1.0 / float(num_features) ** 0.5
    w_row = jax.random.uniform(kw, (1, num_features), minval=-bound, maxval=bound,
                               dtype=jnp.float32)
    b = jax.random.uniform(kb, (1,), minval=-bound, maxval=bound, dtype=jnp.float32)

    probas = logistic_regression_forward(x, w_row, b)
    jax.block_until_ready(probas)

    ref = jax.nn.sigmoid(x @ w_row.T + b[0])
    assert probas.shape == (batch, 1)
    assert jnp.allclose(probas, ref, atol=1e-5, rtol=1e-5)

    # Second check: exercises the multi-step pipelined grid + batch padding path.
    batch2, feat2 = 2000, 128
    k2x, k2w, k2b = jax.random.split(jax.random.PRNGKey(1), 3)
    x2 = jax.random.normal(k2x, (batch2, feat2), dtype=jnp.float32)
    w2 = jax.random.uniform(k2w, (1, feat2), minval=-0.1, maxval=0.1, dtype=jnp.float32)
    b2 = jax.random.uniform(k2b, (1,), minval=-0.1, maxval=0.1, dtype=jnp.float32)

    probas2 = logistic_regression_forward(x2, w2, b2, max_tile_b=512)
    jax.block_until_ready(probas2)
    ref2 = jax.nn.sigmoid(x2 @ w2.T + b2[0])
    assert probas2.shape == (batch2, 1)
    assert jnp.allclose(probas2, ref2, atol=1e-5, rtol=1e-5)

    print("KERNEL_OK")
</pallas_src>

<mosaic_0001>
module attributes {stable_mosaic.version = 11 : i64} {
  func.func @_logreg_kernel(%arg0: i32, %arg1: memref<8x32xf32, #tpu.memory_space<vmem>>, %arg2: memref<1x32xf32, #tpu.memory_space<vmem>>, %arg3: memref<1xf32, #tpu.memory_space<smem>>, %arg4: memref<8x1xf32, #tpu.memory_space<vmem>>) attributes {dimension_semantics = [#tpu.dimension_semantics<parallel>], iteration_bounds = array<i64: 1>, scalar_prefetch = 0 : i64, scratch_operands = 0 : i64, tpu.core_type = #tpu.core_type<tc>, window_params = [{transform_indices = @transform_0, window_bounds = array<i64: 8, 32>}, {pipeline_mode = #tpu.pipeline_mode<synchronous>, transform_indices = @transform_1, window_bounds = array<i64: 1, 32>}, {transform_indices = @transform_2, window_bounds = array<i64: 1>}, {transform_indices = @transform_3, window_bounds = array<i64: 8, 1>}]} {
    %c0 = arith.constant 0 : index
    %c0_0 = arith.constant 0 : index
    %0 = vector.load %arg1[%c0, %c0_0] : memref<8x32xf32, #tpu.memory_space<vmem>>, vector<8x32xf32>
    %c0_1 = arith.constant 0 : index
    %c0_2 = arith.constant 0 : index
    %1 = vector.load %arg2[%c0_1, %c0_2] : memref<1x32xf32, #tpu.memory_space<vmem>>, vector<1x32xf32>
    %2 = vector.broadcast %1 : vector<1x32xf32> to vector<8x32xf32>
    %3 = arith.mulf %0, %2 : vector<8x32xf32>
    %cst = arith.constant dense<0.000000e+00> : vector<8xf32>
    %4 = vector.multi_reduction <add>, %3, %cst [1] : vector<8x32xf32> to vector<8xf32>
    %5 = vector.shape_cast %4 : vector<8xf32> to vector<8x1xf32>
    %c0_3 = arith.constant 0 : index
    %6 = memref.load %arg3[%c0_3] : memref<1xf32, #tpu.memory_space<smem>>
    %7 = vector.broadcast %6 : f32 to vector<8x1xf32>
    %8 = arith.addf %5, %7 : vector<8x1xf32>
    %9 = arith.negf %8 : vector<8x1xf32>
    %10 = math.exp %9 : vector<8x1xf32>
    %cst_4 = arith.constant 1.000000e+00 : f32
    %11 = vector.broadcast %cst_4 : f32 to vector<8x1xf32>
    %12 = arith.addf %11, %10 : vector<8x1xf32>
    %13 = arith.divf %11, %12 : vector<8x1xf32>
    %c0_5 = arith.constant 0 : index
    %c0_6 = arith.constant 0 : index
    %14 = vector.load %arg4[%c0_5, %c0_6] : memref<8x1xf32, #tpu.memory_space<vmem>>, vector<8x1xf32>
    tpu.vector_store %arg4[%c0_5, %c0_6], %13 {strides = array<i32>} : memref<8x1xf32, #tpu.memory_space<vmem>>, vector<8x1xf32>,
    return
  }
  func.func @transform_0(%arg0: i32) -> (i32, i32) {
    %c0_i32 = arith.constant 0 : i32
    %c0_i32_0 = arith.constant 0 : i32
    return %arg0, %c0_i32 : i32, i32
  }
  func.func @transform_1(%arg0: i32) -> (i32, i32) {
    %c0_i32 = arith.constant 0 : i32
    %c0_i32_0 = arith.constant 0 : i32
    %c0_i32_1 = arith.constant 0 : i32
    return %c0_i32, %c0_i32_0 : i32, i32
  }
  func.func @transform_2(%arg0: i32) -> i32 {
    %c0_i32 = arith.constant 0 : i32
    %c0_i32_0 = arith.constant 0 : i32
    return %c0_i32 : i32
  }
  func.func @transform_3(%arg0: i32) -> (i32, i32) {
    %c0_i32 = arith.constant 0 : i32
    %c0_i32_0 = arith.constant 0 : i32
    return %arg0, %c0_i32 : i32, i32
  }
}

</mosaic_0001>

<bundles_post_ra>
// kernel: tpu_custom_call.1
= control target key start
LH: loop header
LB: loop body
LE: loop exit
PB: predicated region body
PF: predicated region fallthrough
CT: control target
= control target key end

     0   :  { %9 = vsyncpa [#allocation4], 0  ;;  %s85_s12 = smov [#allocation3]   ;;  %s118_s0 = inlined_call_operand.hbm [shape: f32[8,32], index: 0, kind: input, shape index: {}]   ;;  %s119_s1 = inlined_call_operand.vmem [shape: f32[1,32], index: 1, kind: input, shape index: {}]   ;;  %s120_s2 = inlined_call_operand.<no memory space> [shape: f32[1], index: 2, kind: input, shape index: {}]   ;;  %s121_s3 = inlined_call_operand.vmem [shape: f32[8,1], index: 3, kind: output, shape index: {}]  }
   0x1   :  { %s16_s13 = sshll.u32 %s85_s12, 4  ;;  %s17_s13 = int_to_ptr.vmem [resolvable:$true] %s16_s13 }
   0x2   :  { %s71_s14 = scalar_lea.vmem %s17_s13, 128  ;;  %p76_p1 = scmp.lt.s32.totalorder %s17_s13, %s17_s13 }
   0x3   :  { %p72_p0 = scmp.ne.s32.totalorder %s17_s13, %s71_s14  ;;  %p77_p2 = scmp.lt.s32.totalorder %s71_s14, %s71_s14 }
   0x5   :  { %p78_p3 = por %p77_p2, %p76_p1 }
   0x7   :  { %p79_p4 = pnand %p78_p3, %p72_p0 }
   0x9   :  { %82 = shalt.err (!%p79_p4)
}
   0xa   :  { %19 = dma.hbm_to_vmem [thread:$0]  %s118_s0, 128, %s17_s13, [#allocation4]  }
   0xb   :  { %83 = dma.done.wait [#allocation4], 128  }
   0xc   :  { %84 = vsyncadd [#allocation4], 4294967168  ;;  %v27_v0 = vld [vmem:[#allocation3] sm:$0xff]  ;;  %vm36_vm0 = vcmask 261120   ;;  %v41_v4 = vstv %s120_s2  ;;  %vm49_vm1 = vcmask 7168  }
   0xd   :  { %v56_v1 = vld [vmem:[%s119_s1] ss:$0 sm:$0xff] }
   0xe   :  { %v35_v2 = vmul.f32 %v56_v1, %v27_v0 }
  0x10   :  { %v37_v3 = vsel %vm36_vm0, %v35_v2, 0.0 }
  0x11   :  { %38 = vadd.xlane.f32.xlu0 %v37_v3 }
  0x9a   :  { %v39_v5 = vpop.xlane.xlu0 %38 }
  0x9b   :  { %v42_v6 = vadd.f32 %v41_v4, %v39_v5 }
  0x9d   :  { %v57_v7 = vmul.f32 -1.442695, %v42_v6 }
  0x9f   :  { %59 = vpow2.f32 %v57_v7 }
  0xac   :  { %v60_v8 = vpop.eup %59 }
  0xad   :  { %v46_v9 = vadd.f32 1.0, %v60_v8 }
  0xaf   :  { %61 = vrcp.f32 %v46_v9 }
  0xbc   :  { %v62_v10 = vpop.eup %61 }
  0xbd   :  { %50 = vst.msk [vmem:[%s121_s3] sm:$0xff] %vm49_vm1, %v62_v10 }
  0xbe   :  { %55 = vsyncpa [#allocation4], 1 }

</bundles_post_ra>
